<compile_context>
chip_gen: v7x
topology: tpu7x:2x2x1
jax: 0.10.0
libtpu: 0.0.40
codegen_flags: <defaults>
</compile_context>

<pallas_src>
import jax
import jax.numpy as jnp
from jax.experimental import pallas as pl
from jax.experimental.pallas import tpu as pltpu

NUM_CLASSES = 18
K_PAD = 128           # lane-dense padded class dim
DEFAULT_TILE_N = 16   # batch tile (capped at ceil(N/2) so >= 2 parallel steps)
DEFAULT_TILE_C = 512  # channel chunk (reduction grid axis)


def _round_up(x, m):
    return (x + m - 1) // m * m


def _classifier_head_kernel(x_ref, w_ref, b_ref, o_ref, acc_ref):
    # x_ref:   (tn, HW, tc) native dtype — NHWC feature-map chunk (C lane-dense)
    # w_ref:   (tc, K_PAD)  f32 — last_layer weight chunk, pre-transposed, 1/HW folded
    # b_ref:   (1, K_PAD)   f32 — last_layer bias (zero-padded)
    # o_ref:   (1, tn, K_PAD) f32 — per-batch-tile output slab
    # acc_ref: (tn, K_PAD)  f32 VMEM scratch, resident across the C grid axis
    k = pl.program_id(1)

    @pl.when(k == 0)
    def _():
        acc_ref[...] = jnp.zeros_like(acc_ref)

    # Global-average-pool partial sum over the sublane HW axis (pure VPU adds),
    # accumulating in f32 without materializing an f32 copy of the whole tile.
    feats = jnp.sum(x_ref[...], axis=1, dtype=jnp.float32)         # (tn, tc)
    acc_ref[...] += jnp.dot(feats, w_ref[...],
                            preferred_element_type=jnp.float32)

    @pl.when(k == pl.num_programs(1) - 1)
    def _():
        o_ref[...] = (acc_ref[...] + b_ref[...])[None]


def prepare_last_layer(weight, bias, hw):
    """One-time preprocessing of the Linear(C, 18) parameters.

    Transposes the weight, folds in the 1/HW global-average-pool scale and
    zero-pads the class dim 18 -> 128 (lane-dense output).  Hoisted out of the
    per-forward path — call once and cache/reuse the result.
    """
    k, c = weight.shape
    w_t = weight.T.astype(jnp.float32) * (1.0 / float(hw))          # (C, K)
    w_pad = jnp.zeros((c, K_PAD), jnp.float32).at[:, :k].set(w_t)   # (C, 128)
    b_pad = jnp.zeros((1, K_PAD), jnp.float32).at[0, :k].set(
        bias.astype(jnp.float32))                                   # (1, 128)
    return w_pad, b_pad


def classifier_head_forward(features_nhwc, w_pad, b_pad, *,
                            num_classes=NUM_CLASSES,
                            tile_n=DEFAULT_TILE_N, tile_c=DEFAULT_TILE_C):
    """Fused global-average-pool + last_layer Linear + .view(-1).

    features_nhwc: (N, H, W, C) feature map entering InceptionV3's final
        avgpool (NHWC — XLA-TPU's natural conv output layout, so no transpose
        is paid upstream).  bf16 features are recommended (kernel is pure
        bandwidth); accumulation is f32 inside the kernel.
    w_pad, b_pad: outputs of prepare_last_layer(weight, bias, H*W).
    Returns (N * num_classes,) f32 logits, matching `last_layer(x).view(-1)`.
    """
    N, H, W, C = features_nhwc.shape
    HW = H * W
    x = features_nhwc.reshape(N, HW, C)          # free reshape, no data movement

    # Batch tile: keep >= 2 grid steps on the parallel axis (v7x has 2 TCs).
    tn = max(1, min(tile_n, N))
    if N > 1:
        tn = min(tn, -(-N // 2))                 # cap at ceil(N/2)

    # Channel chunk (reduction axis): multiple of 128 dividing C, else one chunk.
    tc = min(tile_c, C)
    if tc != C and (C % tc != 0 or tc % 128 != 0):
        tc = C

    grid_n = -(-N // tn)
    grid_c = -(-C // tc)
    grid = (grid_n, grid_c)

    itemsize = jnp.dtype(x.dtype).itemsize
    # Explicit VMEM budget: double-buffered inputs + resident output/accumulator.
    in_buf = tn * _round_up(HW, 8) * _round_up(tc, 128) * itemsize
    w_buf = _round_up(tc, 8) * K_PAD * 4
    b_buf = 8 * K_PAD * 4
    out_buf = _round_up(tn, 8) * K_PAD * 4
    vmem_limit = 2 * (in_buf + w_buf + b_buf + out_buf) + out_buf + (2 << 20)
    vmem_limit = int(min(max(vmem_limit, 8 << 20), 48 << 20))  # safe on v7x 64 MiB

    cost = pl.CostEstimate(
        flops=2 * N * C * K_PAD + N * C * HW,
        transcendentals=0,
        bytes_accessed=(N * HW * C * itemsize              # feature stream
                        + grid_n * C * K_PAD * 4           # weight re-fetch per batch tile
                        + grid_n * tn * K_PAD * 4),        # output
    )

    out = pl.pallas_call(
        _classifier_head_kernel,
        out_shape=jax.ShapeDtypeStruct((grid_n, tn, K_PAD), jnp.float32),
        grid=grid,
        in_specs=[
            pl.BlockSpec((tn, HW, tc), lambda i, k: (i, 0, k)),   # streamed features
            pl.BlockSpec((tc, K_PAD), lambda i, k: (k, 0)),       # weight chunk
            pl.BlockSpec((1, K_PAD), lambda i, k: (0, 0)),        # bias (resident)
        ],
        out_specs=pl.BlockSpec((1, tn, K_PAD), lambda i, k: (i, 0, 0)),
        scratch_shapes=[pltpu.VMEM((tn, K_PAD), jnp.float32)],
        compiler_params=pltpu.CompilerParams(
            dimension_semantics=("parallel", "arbitrary"),
            vmem_limit_bytes=vmem_limit,
        ),
        cost_estimate=cost,
    )(x, w_pad, b_pad)

    # Drop batch-tile and class-dim padding, then match the torch `.view(-1)`.
    out = out.reshape(grid_n * tn, K_PAD)[:N, :num_classes]
    return out.reshape(-1)


if __name__ == "__main__":
    key = jax.random.PRNGKey(0)
    k_feat, k_w, k_b = jax.random.split(key, 3)

    # Small shapes consistent with the forward: batch=2, feature channels C=256
    # (stands in for InceptionV3's 2048), 4x4 spatial entering the final pool.
    N, H, W, C = 2, 4, 4, 256
    features = jax.random.normal(k_feat, (N, H, W, C), dtype=jnp.float32)

    # Deterministic nn.Linear(C, 18) init (PyTorch default U(-1/sqrt(C), 1/sqrt(C))).
    bound = 1.0 / jnp.sqrt(jnp.float32(C))
    weight = jax.random.uniform(k_w, (NUM_CLASSES, C), jnp.float32, -bound, bound)
    bias = jax.random.uniform(k_b, (NUM_CLASSES,), jnp.float32, -bound, bound)

    # One-time parameter prep (hoisted out of the per-call path).
    w_pad, b_pad = prepare_last_layer(weight, bias, H * W)

    out = classifier_head_forward(features, w_pad, b_pad)
    out = jax.block_until_ready(out)

    # Pure-JAX reference of the same semantics.
    feats_ref = jnp.mean(features, axis=(1, 2))              # (N, C)
    ref = (feats_ref @ weight.T + bias).reshape(-1)          # (N*18,)
    assert out.shape == (N * NUM_CLASSES,)
    assert jnp.allclose(out, ref, atol=1e-4, rtol=1e-4)

    print("KERNEL_OK")
</pallas_src>

<mosaic_0001>
module attributes {stable_mosaic.version = 11 : i64} {
  func.func @_classifier_head_kernel(%arg0: i32, %arg1: i32, %arg2: memref<1x16x256xf32, #tpu.memory_space<vmem>>, %arg3: memref<256x128xf32, #tpu.memory_space<vmem>>, %arg4: memref<1x128xf32, #tpu.memory_space<vmem>>, %arg5: memref<1x1x128xf32, #tpu.memory_space<vmem>>, %arg6: memref<1x128xf32, #tpu.memory_space<vmem>>) attributes {dimension_semantics = [#tpu.dimension_semantics<parallel>, #tpu.dimension_semantics<arbitrary>], iteration_bounds = array<i64: 2, 1>, scalar_prefetch = 0 : i64, scratch_operands = 1 : i64, tpu.core_type = #tpu.core_type<tc>, window_params = [{transform_indices = @transform_0, window_bounds = array<i64: 1, 16, 256>}, {transform_indices = @transform_1, window_bounds = array<i64: 256, 128>}, {pipeline_mode = #tpu.pipeline_mode<synchronous>, transform_indices = @transform_2, window_bounds = array<i64: 1, 128>}, {transform_indices = @transform_3, window_bounds = array<i64: 1, 1, 128>}]} {
    %c0_i32 = arith.constant 0 : i32
    %0 = arith.cmpi eq, %arg1, %c0_i32 : i32
    %1 = arith.extui %0 : i1 to i32
    %c0_i32_0 = arith.constant 0 : i32
    %2 = arith.cmpi ne, %1, %c0_i32_0 : i32
    scf.if %2 {
      %cst_12 = arith.constant 0.000000e+00 : f32
      %13 = vector.broadcast %cst_12 : f32 to vector<1x128xf32>
      %c0_13 = arith.constant 0 : index
      %c0_14 = arith.constant 0 : index
      %14 = vector.load %arg6[%c0_13, %c0_14] : memref<1x128xf32, #tpu.memory_space<vmem>>, vector<1x128xf32>
      tpu.vector_store %arg6[%c0_13, %c0_14], %13 {strides = array<i32>} : memref<1x128xf32, #tpu.memory_space<vmem>>, vector<1x128xf32>,
    } else {
    }
    %c0 = arith.constant 0 : index
    %c0_1 = arith.constant 0 : index
    %c0_2 = arith.constant 0 : index
    %3 = vector.load %arg2[%c0, %c0_1, %c0_2] : memref<1x16x256xf32, #tpu.memory_space<vmem>>, vector<1x16x256xf32>
    %cst = arith.constant dense<0.000000e+00> : vector<1x256xf32>
    %4 = vector.multi_reduction <add>, %3, %cst [1] : vector<1x16x256xf32> to vector<1x256xf32>
    %c0_3 = arith.constant 0 : index
    %c0_4 = arith.constant 0 : index
    %5 = vector.load %arg6[%c0_3, %c0_4] : memref<1x128xf32, #tpu.memory_space<vmem>>, vector<1x128xf32>
    %c0_5 = arith.constant 0 : index
    %c0_6 = arith.constant 0 : index
    %6 = vector.load %arg3[%c0_5, %c0_6] : memref<256x128xf32, #tpu.memory_space<vmem>>, vector<256x128xf32>
    %cst_7 = arith.constant dense<0.000000e+00> : vector<1x128xf32>
    %7 = tpu.matmul %4, %6, %cst_7 {dimension_numbers = #tpu.dot_dimension_numbers<[1], [0], [0], [1], [0, 0, 1, 1], [], []>} : vector<1x256xf32>, vector<256x128xf32>, vector<1x128xf32> -> vector<1x128xf32>
    %8 = arith.addf %5, %7 : vector<1x128xf32>
    %c0_8 = arith.constant 0 : index
    %c0_9 = arith.constant 0 : index
    %9 = vector.load %arg6[%c0_8, %c0_9] : memref<1x128xf32, #tpu.memory_space<vmem>>, vector<1x128xf32>
    tpu.vector_store %arg6[%c0_8, %c0_9], %8 {strides = array<i32>} : memref<1x128xf32, #tpu.memory_space<vmem>>, vector<1x128xf32>,
    %c0_i32_10 = arith.constant 0 : i32
    %10 = arith.cmpi eq, %arg1, %c0_i32_10 : i32
    %11 = arith.extui %10 : i1 to i32
    %c0_i32_11 = arith.constant 0 : i32
    %12 = arith.cmpi ne, %11, %c0_i32_11 : i32
    scf.if %12 {
      %c0_12 = arith.constant 0 : index
      %c0_13 = arith.constant 0 : index
      %13 = vector.load %arg6[%c0_12, %c0_13] : memref<1x128xf32, #tpu.memory_space<vmem>>, vector<1x128xf32>
      %c0_14 = arith.constant 0 : index
      %c0_15 = arith.constant 0 : index
      %14 = vector.load %arg4[%c0_14, %c0_15] : memref<1x128xf32, #tpu.memory_space<vmem>>, vector<1x128xf32>
      %15 = arith.addf %13, %14 : vector<1x128xf32>
      %16 = vector.shape_cast %15 : vector<1x128xf32> to vector<1x1x128xf32>
      %c0_16 = arith.constant 0 : index
      %c0_17 = arith.constant 0 : index
      %c0_18 = arith.constant 0 : index
      %17 = vector.load %arg5[%c0_16, %c0_17, %c0_18] : memref<1x1x128xf32, #tpu.memory_space<vmem>>, vector<1x1x128xf32>
      tpu.vector_store %arg5[%c0_16, %c0_17, %c0_18], %16 {strides = array<i32>} : memref<1x1x128xf32, #tpu.memory_space<vmem>>, vector<1x1x128xf32>,
    } else {
    }
    return
  }
  func.func @transform_0(%arg0: i32, %arg1: i32) -> (i32, i32, i32) {
    %c0_i32 = arith.constant 0 : i32
    %c0_i32_0 = arith.constant 0 : i32
    return %arg0, %c0_i32, %arg1 : i32, i32, i32
  }
  func.func @transform_1(%arg0: i32, %arg1: i32) -> (i32, i32) {
    %c0_i32 = arith.constant 0 : i32
    %c0_i32_0 = arith.constant 0 : i32
    return %arg1, %c0_i32 : i32, i32
  }
  func.func @transform_2(%arg0: i32, %arg1: i32) -> (i32, i32) {
    %c0_i32 = arith.constant 0 : i32
    %c0_i32_0 = arith.constant 0 : i32
    %c0_i32_1 = arith.constant 0 : i32
    return %c0_i32, %c0_i32_0 : i32, i32
  }
  func.func @transform_3(%arg0: i32, %arg1: i32) -> (i32, i32, i32) {
    %c0_i32 = arith.constant 0 : i32
    %c0_i32_0 = arith.constant 0 : i32
    %c0_i32_1 = arith.constant 0 : i32
    return %arg0, %c0_i32, %c0_i32_0 : i32, i32, i32
  }
}

</mosaic_0001>

<bundles_post_ra>
// kernel: tpu_custom_call.1
= control target key start
LH: loop header
LB: loop body
LE: loop exit
PB: predicated region body
PF: predicated region fallthrough
CT: control target
= control target key end

     0   :  { %8 = vsyncpa [#allocation4], 0  ;;  %s1027_s0 = inlined_call_operand.hbm [shape: f32[2,16,256], index: 0, kind: input, shape index: {}]   ;;  %s1028_s1 = inlined_call_operand.hbm [shape: f32[256,128], index: 1, kind: input, shape index: {}]   ;;  %s1029_s2 = inlined_call_operand.vmem [shape: f32[1,128], index: 2, kind: input, shape index: {}]   ;;  %s1030_s3 = inlined_call_operand.hbm [shape: f32[2,1,128], index: 3, kind: output, shape index: {}]  }
   0x1   :  { %10 = vsyncpa [#allocation4 + $0x1], 0 }
   0x2   :  { %11 = vsyncpa [#allocation7], 0 }
   0x3   :  { %12 = vsyncpa [#allocation5], 0 }
   0x4   :  { %14 = vsyncpa [#allocation5 + $0x1], 0  ;;  %s800_s12 = smov 0   ;;  %s802_s13 = smov 0  }
   0x5   :  { %s804_s14 = smov 0   ;;  %s806_s15 = smov 0  }
   0x6   :  { %s808_s16 = smov 0   ;;  %s810_s17 = smov 0  }
   0x7 LB: > { %s466_s18 = sadd.s32 4294967295, %s770_s17   ;;  %s467_s19 = sadd.s32 4294967294, %s770_s17   ;;  %s770_s17 = sphi %s810_s17, %s20_s17   ;;  %s766_s16 = sphi %s808_s16, %s1054_s16   ;;  %s762_s15 = sphi %s806_s15, %s1053_s15   ;;  %s758_s14 = sphi %s804_s14, %s1052_s14   ;;  %s754_s13 = sphi %s802_s13, %s1051_s13   ;;  %s750_s12 = sphi %s800_s12, %s1050_s12  }
   0x8   : > { %p54_p0 = scmp.ne.s32.totalorder %s754_s13, %s750_s12  ;;  %p834_p1 = scmp.eq.s32.totalorder %s466_s18, 0 }
   0x9   : > { %p838_p2 = scmp.eq.s32.totalorder %s466_s18, 1  ;;  %p131_p3 = scmp.eq.s32.totalorder %s467_s19, 1 }
   0xa   : > { %s1035_s20 = scalar_select %p834_p1, 1, 0 }
   0xb   : > { %s1036_s21 = scalar_select %p838_p2, 1, 0 }
   0xc   : > { %p844_p4 = por %p834_p1, %p54_p0  ;;  %p468_p5 = scmp.ge.s32.totalorder %s770_s17, 1 }
   0xd   : > { %p849_p6 = por %p131_p3, %p54_p0  ;;  %p138_p7 = scmp.lt.s32.totalorder %s770_s17, 3 }
   0xe   : > { %s1037_s22 = scalar_select %p844_p4, 1, 0 }
   0xf   : > { %s1038_s23 = scalar_select %p849_p6, 1, 0 }
  0x10   : > { %p854_p8 = pnand %p468_p5, %p138_p7  ;;  %s772_s25 = smov [#allocation6]  }
  0x11   : > { %s153_s26 = sshll.u32 %s772_s25, 4  ;;  %s32_s28 = sadd.s32 1, %s766_s16  ;;  %s154_s26 = int_to_ptr.vmem [resolvable:$true] %s153_s26 }
  0x12   : > { %s1039_s24 = scalar_select %p854_p8, 1, 0 }
  0x13   : > { %p556_p9 = pneg %p854_p8  ;;  %s626_s4 = scalar_lea.hbm %s1028_s1, 4096 }
  0x14   : > { %p627_p12 = scmp.ne.s32.totalorder %s1028_s1, %s626_s4  ;;  %p633_p5 = scmp.lt.u32.totalorder %s626_s4, %s1028_s1 }
  0x15   : > { %p863_p11 = pnand %p556_p9, %p834_p1 }
  0x17   : > { %p628_p13 = pneg %p863_p11 }
  0x19   : > { %p629_p0 = pnand %p628_p13, %p627_p12 }
  0x1b   : > { %p630_p3 = pneg %p629_p0 }
  0x1d   : > { %p635_p7 = pnand %p633_p5, %p630_p3 }
  0x1f   : > { %638 = shalt.err (!%p635_p7)
}
  0x20   : > { %s639_s9 = scalar_lea.vmem %s154_s26, 4096  ;;  %p647_p1 = scmp.lt.s32.totalorder %s154_s26, %s154_s26 }
  0x21   : > { %p640_p9 = scmp.ne.s32.totalorder %s154_s26, %s639_s9  ;;  %p648_p4 = scmp.lt.s32.totalorder %s639_s9, %s639_s9 }
  0x23   : > { %p642_p10 = pnand %p640_p9, %p628_p13  ;;  %p649_p8 = por %p648_p4, %p647_p1 }
  0x25   : > { %p643_p6 = pneg %p642_p10 }
  0x27   : > { %p650_p2 = pnand %p649_p8, %p643_p6 }
  0x29   : > { %653 = shalt.err (!%p650_p2)
}
  0x2a   : > { %s773_s10 = smov 128   ;;  %s774_s11 = smov 8  }
  0x2b   : > { %559 = dma.hbm_to_vmem [thread:$0]  (!%p863_p11), %s1028_s1, 4096, %s154_s26, [#allocation7], %s773_s10, %s773_s10, %s774_s11  }
  0x2c   : > { %p34_p1 = scmp.ge.s32.totalorder %s32_s28, 2  ;;  %s41_s25 = sadd.s32 1, %s758_s14 }
  0x2d   : > { %p48_p2 = scmp.ne.s32.totalorder %s758_s14, %s754_s13  ;;  %p49_p4 = scmp.eq.s32.totalorder %s770_s17, 0 }
  0x2e   : > { %s1056_s28 = smov (%p34_p1, %s32_s28), 0  ;;  %p1042_p8 = scmp.ne.s32.totalorder %s1036_s21, 0 }
  0x2f   : > { %p890_p6 = por %p49_p4, %p48_p2  ;;  %s36_s27 = ssub.s32 %s766_s16, %s1056_s28 }
  0x30   : > { %p896_p10 = por %p1042_p8, %p48_p2  ;;  %p569_p12 = scmp.lt.s32.totalorder %s770_s17, 2 }
  0x31   : > { %p39_p11 = scmp.eq.s32.totalorder %s36_s27, 0  ;;  %s170_s26 = sand.u32 1, %s758_s14  }
  0x32   : > { %s471_s4 = sshll.u32 %s170_s26, 5  ;;  %s480_s6 = sshll.u32 %s766_s16, 9 }
  0x33   : > { %s905_s5 = scalar_select %p39_p11, %s758_s14, %s41_s25  }
  0x34   : > { %s911_s9 = scalar_lea.hbm %s1027_s0, %s480_s6  ;;  %s174_s21 = scalar_lea.vmem [#allocation3], %s471_s4 }
  0x35   : > { %s183_s10 = sshll.u32 %s174_s21, 4  ;;  %p917_p13 = pnand %p569_p12, %p890_p6  ;;  %s913_s10 = int_to_ptr.vmem [resolvable:$true] %s183_s10 }
  0x36   : > { %s921_s18 = scalar_lea.sflag [#allocation4], %s170_s26  ;;  %s654_s19 = scalar_lea.hbm %s911_s9, 512 }
  0x37   : > { %p655_p0 = scmp.ne.s32.totalorder %s911_s9, %s654_s19  ;;  %p656_p3 = pneg %p917_p13 }
  0x38   : > { %s659_s29 = scalar_lea.hbm %s1027_s0, 1024  ;;  %p660_p9 = scmp.lt.u32.totalorder %s911_s9, %s1027_s0 }
  0x39   : > { %p657_p5 = pnand %p656_p3, %p655_p0  ;;  %p661_p1 = scmp.lt.u32.totalorder %s659_s29, %s654_s19 }
  0x3a   : > { %p663_p4 = scmp.lt.u32.totalorder %s654_s19, %s911_s9 }
  0x3b   : > { %p658_p7 = pneg %p657_p5  ;;  %p662_p2 = por %p661_p1, %p660_p9 }
  0x3d   : > { %p664_p6 = por %p663_p4, %p662_p2 }
  0x3f   : > { %p665_p8 = pnand %p664_p6, %p658_p7 }
  0x41   : > { %668 = shalt.err (!%p665_p8)
}
  0x42   : > { %s669_s26 = scalar_lea.vmem %s913_s10, 512  ;;  %s775_s7 = smov [#allocation3]  }
  0x43   : > { %p670_p12 = scmp.ne.s32.totalorder %s913_s10, %s669_s26  ;;  %s674_s8 = sshll.u32 %s775_s7, 4  ;;  %s675_s8 = int_to_ptr.vmem [resolvable:$false] %s674_s8 }
  0x44   : > { %s676_s21 = scalar_lea.vmem %s675_s8, 1024  ;;  %p677_p5 = scmp.lt.s32.totalorder %s913_s10, %s675_s8 }
  0x45   : > { %p672_p11 = pnand %p670_p12, %p656_p3  ;;  %p678_p9 = scmp.lt.s32.totalorder %s676_s21, %s669_s26 }
  0x47   : > { %p673_p0 = pneg %p672_p11  ;;  %p679_p1 = por %p678_p9, %p677_p5 }
  0x49   : > { %p680_p2 = pnand %p679_p1, %p673_p0 }
  0x4b   : > { %683 = shalt.err (!%p680_p2)
}
  0x4c   : > { %s776_s19 = smov 256   ;;  %s777_s25 = smov 16  }
  0x4d   : > { %563 = dma.hbm_to_vmem [thread:$0]  (!%p917_p13), %s911_s9, 512, %s913_s10, %s921_s18, %s776_s19, %s776_s19, %s777_s25  }
  0x4e   : > { %p1045_p3 = scmp.ne.s32.totalorder %s1039_s24, 0 }
  0x4f   : > { %s952_s27 = sand.u32 (!%p1045_p3), 1, %s754_s13   ;;  %p1046_p7 = scmp.ne.s32.totalorder (!%p1045_p3), %s1037_s22, 0 }
  0x50   : > { %195 = sbr.rel (%p1045_p3) target bundleno = 367 (0x16f), region = 32  ;;  %s475_s29 = sshll.u32 (!%p1045_p3), %s952_s27, 5 }
  0x51   : > { %s198_s4 = scalar_lea.sflag (!%p1045_p3), [#allocation4], %s952_s27  ;;  %s956_s6 = scalar_lea.vmem (!%p1045_p3), [#allocation3], %s475_s29 }
  0x57   : > { %737 = dma.done.wait (%p1046_p7), %s198_s4, 512  }
  0x58   : > { %739 = vsyncadd (%p1046_p7), %s198_s4, 4294966784  ;;  %p1047_p13 = scmp.ne.s32.totalorder %s1035_s20, 0 }
  0x5a   : > { %741 = dma.done.wait (%p1047_p13), [#allocation7], 4096  }
  0x5b   : > { %743 = vsyncadd (%p1047_p13), [#allocation7], 4294963200  ;;  %v269_v0 = vld [vmem:[#allocation6 + $0x80] sm:$0xff]  ;;  %v270_v1 = vld [vmem:[#allocation6 + $0x88] sm:$0xff]  ;;  %s477_s24 = sshll.u32 %s762_s15, 4  ;;  %s226_s9 = scalar_lea.vmem [#allocation8], %s952_s27 }
  0x5c   : > { %v253_v2 = vld [vmem:[#allocation6] sm:$0xff]  ;;  %v516_v3 = vpack.c.bf16 %v270_v1, %v269_v0  ;;  %v254_v4 = vld [vmem:[#allocation6 + $0x8] sm:$0xff]  ;;  %v271_v5 = vld [vmem:[#allocation6 + $0x90] sm:$0xff]  ;;  %s377_s10 = sshll.u32 %s226_s9, 4  ;;  %s978_s26 = scalar_lea.hbm %s1030_s3, %s477_s24  ;;  %s980_s10 = int_to_ptr.vmem [resolvable:$true] %s377_s10 }
  0x5d   : > { %v272_v6 = vld [vmem:[#allocation6 + $0x98] sm:$0xff]  ;;  %v518_v7 = vpack.c.bf16 %v254_v4, %v253_v2  ;;  %v255_v9 = vld [vmem:[#allocation6 + $0x10] sm:$0xff]  ;;  %v273_v11 = vld [vmem:[#allocation6 + $0xa0] sm:$0xff]  ;;  %v778_v2 = vmov 0.0   ;;  %s365_s7 = scalar_lea.sflag [#allocation5], %s952_s27  ;;  %s684_s8 = scalar_lea.vmem %s980_s10, 16 }
  0x5e   : > { %v520_v8 = vpack.c.bf16 %v272_v6, %v271_v5  ;;  %v256_v10 = vld [vmem:[#allocation6 + $0x18] sm:$0xff]  ;;  %517 = vmatprep.subr.bf16.mxu0 %v516_v3  ;;  %v274_v12 = vld [vmem:[#allocation6 + $0xa8] sm:$0xff]  ;;  %v257_v15 = vld [vmem:[#allocation6 + $0x20] sm:$0xff]  ;;  %233 = vst [vmem:[#allocation2] sm:$0x1] %v778_v2  ;;  %p685_p4 = scmp.ne.s32.totalorder %s980_s10, %s684_s8  ;;  %s779_s15 = smov [#allocation8]  }
  0x5f   : > { %519 = vmatpush3.bf16.msra.mxu0 %v518_v7  ;;  %v522_v13 = vpack.c.bf16 %v256_v10, %v255_v9  ;;  %v524_v14 = vpack.c.bf16 %v274_v12, %v273_v11  ;;  %v258_v16 = vld [vmem:[#allocation6 + $0x28] sm:$0xff]  ;;  %v275_v17 = vld [vmem:[#allocation6 + $0xb0] sm:$0xff]  ;;  %v276_v18 = vld [vmem:[#allocation6 + $0xb8] sm:$0xff]  ;;  %s688_s21 = sshll.u32 %s779_s15, 4  ;;  %s689_s21 = int_to_ptr.vmem [resolvable:$false] %s688_s21 }
  0x60   : > { %521 = vmatprep.subr.bf16.mxu0 %v520_v8  ;;  %v526_v19 = vpack.c.bf16 %v258_v16, %v257_v15  ;;  %v528_v20 = vpack.c.bf16 %v276_v18, %v275_v17  ;;  %v259_v21 = vld [vmem:[#allocation6 + $0x30] sm:$0xff]  ;;  %v260_v22 = vld [vmem:[#allocation6 + $0x38] sm:$0xff]  ;;  %v277_v23 = vld [vmem:[#allocation6 + $0xc0] sm:$0xff]  ;;  %p686_p6 = pnand %p685_p4, %p896_p10  ;;  %s690_s19 = scalar_lea.vmem %s689_s21, 32 }
  0x61   : > { %v278_v24 = vld [vmem:[#allocation6 + $0xc8] sm:$0xff]  ;;  %v237_v26 = vld [vmem:[%s956_s6 + $0x18] sm:$0xff]  ;;  %v234_v27 = vld [vmem:[%s956_s6] sm:$0xff]  ;;  %v530_v29 = vpack.c.bf16 %v260_v22, %v259_v21  ;;  %p691_p12 = scmp.lt.s32.totalorder %s980_s10, %s689_s21  ;;  %p692_p11 = scmp.lt.s32.totalorder %s690_s19, %s684_s8 }
  0x62   : > { %v235_v25 = vld [vmem:[%s956_s6 + $0x8] sm:$0xff]  ;;  %v236_v28 = vld [vmem:[%s956_s6 + $0x10] sm:$0xff]  ;;  %v532_v32 = vpack.c.bf16 %v278_v24, %v277_v23  ;;  %v261_v33 = vld [vmem:[#allocation6 + $0x40] sm:$0xff]  ;;  %p687_p8 = pneg %p686_p6 }
  0x63   : > { %523 = vmatpush3.bf16.msra.mxu0 %v522_v13  ;;  %v245_v30 = vadd.f32 %v237_v26, %v235_v25  ;;  %v238_v31 = vadd.f32 %v236_v28, %v234_v27  ;;  %v262_v34 = vld [vmem:[#allocation6 + $0x48] sm:$0xff]  ;;  %v279_v35 = vld [vmem:[#allocation6 + $0xd0] sm:$0xff]  ;;  %v280_v36 = vld [vmem:[#allocation6 + $0xd8] sm:$0xff]  ;;  %p693_p0 = por %p692_p11, %p691_p12 }
  0x64   : > { %525 = vmatprep.subr.bf16.mxu0 %v524_v14  ;;  %v534_v39 = vpack.c.bf16 %v262_v34, %v261_v33  ;;  %v536_v42 = vpack.c.bf16 %v280_v36, %v279_v35  ;;  %v263_v43 = vld [vmem:[#allocation6 + $0x50] sm:$0xff]  ;;  %v264_v44 = vld [vmem:[#allocation6 + $0x58] sm:$0xff]  ;;  %v281_v45 = vld [vmem:[#allocation6 + $0xe0] sm:$0xff] }
  0x65   : > { %v246_v37 = vrot.slane %v245_v30, 4  ;;  %v239_v38 = vrot.slane %v238_v31, 4  ;;  %v282_v46 = vld [vmem:[#allocation6 + $0xe8] sm:$0xff]  ;;  %v538_v49 = vpack.c.bf16 %v264_v44, %v263_v43  ;;  %v265_v52 = vld [vmem:[#allocation6 + $0x60] sm:$0xff]  ;;  %v283_v54 = vld [vmem:[#allocation6 + $0xf0] sm:$0xff]  ;;  %p694_p5 = pnand %p693_p0, %p687_p8 }
  0x66   : > { %v540_v51 = vpack.c.bf16 %v282_v46, %v281_v45  ;;  %v266_v53 = vld [vmem:[#allocation6 + $0x68] sm:$0xff]  ;;  %v284_v55 = vld [vmem:[#allocation6 + $0xf8] sm:$0xff]  ;;  %v267_v61 = vld [vmem:[#allocation6 + $0x70] sm:$0xff] }
  0x67   : > { %527 = vmatpush3.bf16.msra.mxu0 %v526_v19  ;;  %v247_v40 = vadd.f32 %v246_v37, %v245_v30  ;;  %v240_v41 = vadd.f32 %v239_v38, %v238_v31  ;;  %v542_v58 = vpack.c.bf16 %v266_v53, %v265_v52  ;;  %v544_v60 = vpack.c.bf16 %v284_v55, %v283_v54  ;;  %v268_v62 = vld [vmem:[#allocation6 + $0x78] sm:$0xff] }
  0x68   : > { %529 = vmatprep.subr.bf16.mxu0 %v528_v20  ;;  %v546_v0 = vpack.c.bf16 %v268_v62, %v267_v61  ;;  %v252_v4 = vld [vmem:[#allocation2] sm:$0x1] }
  0x69   : > { %v248_v47 = vrot.slane %v247_v40, 2  ;;  %v241_v48 = vrot.slane %v240_v41, 2  ;;  %v361_v8 = vld [vmem:[%s1029_s2] sm:$0x1] }
  0x6b   : > { %531 = vmatpush3.bf16.msra.mxu0 %v530_v29  ;;  %v249_v50 = vadd.f32 %v248_v47, %v247_v40  ;;  %v242_v57 = vadd.f32 %v241_v48, %v240_v41 }
  0x6c   : > { %533 = vmatprep.subr.bf16.mxu0 %v532_v32 }
  0x6d   : > { %v250_v56 = vrot.slane %v249_v50, 1  ;;  %v243_v63 = vrot.slane %v242_v57, 1 }
  0x6f   : > { %535 = vmatpush3.bf16.msra.mxu0 %v534_v39  ;;  %v251_v59 = vadd.f32 %v250_v56, %v249_v50  ;;  %v244_v1 = vadd.f32 %v243_v63, %v242_v57 }
  0x70   : > { %537 = vmatprep.subr.bf16.mxu0 %v536_v42 }
  0x71   : > { %349 = vmatprep.mubr.f32.mxu0 %v251_v59 }
  0x73   : > { %539 = vmatpush3.bf16.msra.mxu0 %v538_v49 }
  0x74   : > { %541 = vmatprep.subr.bf16.mxu0 %v540_v51 }
  0x77   : > { %543 = vmatpush3.bf16.msra.mxu0 %v542_v58 }
  0x78   : > { %545 = vmatprep.subr.bf16.mxu0 %v544_v60 }
  0x7b   : > { %547 = vmatpush3.bf16.msra.mxu0 %v546_v0 }
  0x7e   : > { %350 = vmatmul.mubr.f32.vlgmr.msra.gmra.mrb[0].mxu0 %v244_v1 }
 0x151   : > { %v513_v3 = vpop.f32.mrb[0].mxu0 }
 0x152   : > { %v514_v5 = vpop.f32.mrb[1].mxu0 }
 0x153   : > { %v515_v6 = vadd.f32 %v514_v5, %v513_v3 }
 0x155   : > { %v355_v7 = vadd.f32 %v515_v6, %v252_v4 }
 0x157   : > { %356 = vst [vmem:[#allocation2] sm:$0x1] %v355_v7 }
 0x15e   : > { %v360_v9 = vld [vmem:[#allocation2] sm:$0x1] }
 0x15f   : > { %v362_v10 = vadd.f32 %v361_v8, %v360_v9 }
 0x161   : > { %363 = vst [vmem:[%s226_s9] sm:$0x1] %v362_v10 }
 0x162   : > { %697 = shalt.err (!%p694_p5)
}
 0x163   : > { %s698_s25 = scalar_lea.hbm %s978_s26, 16  ;;  %s702_s4 = scalar_lea.hbm %s1030_s3, 32 }
 0x164   : > { %p699_p9 = scmp.ne.s32.totalorder %s978_s26, %s698_s25  ;;  %p703_p3 = scmp.lt.u32.totalorder %s978_s26, %s1030_s3 }
 0x165   : > { %p704_p7 = scmp.lt.u32.totalorder %s702_s4, %s698_s25  ;;  %p706_p4 = scmp.lt.u32.totalorder %s698_s25, %s978_s26 }
 0x166   : > { %p700_p1 = pnand %p699_p9, %p896_p10 }
 0x167   : > { %p705_p13 = por %p704_p7, %p703_p3 }
 0x168   : > { %p701_p2 = pneg %p700_p1 }
 0x169   : > { %p707_p6 = por %p706_p4, %p705_p13 }
 0x16b   : > { %p708_p8 = pnand %p707_p6, %p701_p2 }
 0x16d   : > { %711 = shalt.err (!%p708_p8)
}
 0x16e   : > { %554 = dma.vmem_to_hbm [thread:$0]  (%p896_p10), %s980_s10, 16, %s978_s26, %s365_s7  }
 0x16f PF: > { %s389_s22 = sand.u32 1, %s750_s12   ;;  %p1048_p12 = scmp.ne.s32.totalorder %s1038_s23, 0 }
 0x170   : > { %p1049_p11 = scmp.ge.s32.totalorder %s770_s17, 2  ;;  %s390_s24 = scalar_lea.sflag [#allocation5], %s389_s22 }
 0x172   : > { %p565_p0 = pnand %p1049_p11, %p1048_p12 }
 0x174   : > { %745 = dma.done.wait (!%p565_p0), %s390_s24, 16  }
 0x175   : > { %747 = vsyncadd (!%p565_p0), %s390_s24, 4294967280  ;;  %s20_s17 = sadd.s32 1, %s770_s17   ;;  %s1050_s12 = smov %s754_s13 }
 0x176   : > { %p17_p5 = scmp.ge.s32.totalorder %s20_s17, 4   ;;  %s1051_s13 = smov %s758_s14 }
 0x177   : > { %s1052_s14 = smov %s905_s5  ;;  %s1053_s15 = smov %s766_s16 }
 0x178   : > { %s1054_s16 = smov %s1056_s28  ;;  %19 = sbr.rel (!%p17_p5) target bundleno = 7 (0x7), region = 90 }
 0x17f   :  { %394 = vsyncpa [#allocation4], 1 }
 0x180   :  { %396 = vsyncpa [#allocation4 + $0x1], 1 }
 0x181   :  { %397 = vsyncpa [#allocation7], 1 }
 0x182   :  { %398 = vsyncpa [#allocation5], 1 }
 0x183   :  { %400 = vsyncpa [#allocation5 + $0x1], 1 }

</bundles_post_ra>
